<compile_context>
chip_gen: v6e
topology: v6e:2x2x1
jax: 0.10.0
libtpu: 0.0.40
codegen_flags: <defaults>
</compile_context>

<pallas_src>
import functools

import jax
import jax.numpy as jnp
from jax.experimental import pallas as pl
from jax.experimental.pallas import tpu as pltpu


def _dueling_kernel(x_ref, w1_ref, b1_ref, wq_ref, bq_ref, o_ref):
    # --- stem: Linear + SiLU (MXU matmul, f32 accumulation, EUP sigmoid) ---
    h = jnp.dot(x_ref[...], w1_ref[...], preferred_element_type=jnp.float32)
    h = h + b1_ref[...].astype(jnp.float32)          # (tm, hidden) + (1, hidden)
    h = h * jax.nn.sigmoid(h)                        # SiLU

    # --- fused dueling head: one MXU matmul over the folded weights ---
    q = jnp.dot(h.astype(wq_ref.dtype), wq_ref[...],
                preferred_element_type=jnp.float32)
    q = q + bq_ref[...].astype(jnp.float32)          # (tm, num_tokens) + (1, num_tokens)

    o_ref[...] = q.astype(o_ref.dtype)


@functools.partial(jax.jit, static_argnames=("tm",))
def dueling_head(x, w1, b1, wa, ba, wv, bv, *, tm=512):
    """x: (..., dim) -> q_values: (..., num_tokens)."""
    orig_shape = x.shape
    dim = orig_shape[-1]
    hidden = w1.shape[1]
    num_tokens = wa.shape[1]

    # ---- offline fold of value head + mean-subtraction (exact algebra) ----
    # q = (h@Wa + ba) - mean(h@Wa + ba) + (h@Wv + bv)
    #   = h @ (Wa - rowmean(Wa) + Wv) + (ba - mean(ba) + bv)
    wq = (wa - jnp.mean(wa, axis=1, keepdims=True) + wv).astype(w1.dtype)
    bq = (ba - jnp.mean(ba) + bv).reshape(1, num_tokens)
    b1_2d = b1.reshape(1, hidden)

    xm = x.reshape(-1, dim)
    M = xm.shape[0]

    # ---- row tiling: big tiles for HBM efficiency, ragged M via padding ----
    sub = 16 if x.dtype == jnp.bfloat16 else 8      # sublane packing of dtype
    tm_eff = min(tm, -(-M // sub) * sub)            # shrink for tiny inputs
    tm_eff = max(sub, -(-tm_eff // sub) * sub)      # keep multiple of sublane
    grid_m = pl.cdiv(M, tm_eff)
    m_pad = grid_m * tm_eff
    if m_pad != M:
        xm = jnp.pad(xm, ((0, m_pad - M), (0, 0)))  # zero rows -> finite, sliced off

    # advisory cost hint (lets XLA's scheduler place the custom call sanely)
    x_item = jnp.dtype(x.dtype).itemsize
    w_item = jnp.dtype(w1.dtype).itemsize
    cost = pl.CostEstimate(
        flops=2 * m_pad * (dim * hidden + hidden * num_tokens),
        transcendentals=m_pad * hidden,
        bytes_accessed=(m_pad * (dim + num_tokens)) * x_item
        + (dim * hidden + hidden * num_tokens) * w_item,
    )

    out = pl.pallas_call(
        _dueling_kernel,
        out_shape=jax.ShapeDtypeStruct((m_pad, num_tokens), x.dtype),
        grid_spec=pltpu.PrefetchScalarGridSpec(
            num_scalar_prefetch=0,
            grid=(grid_m,),
            in_specs=[
                pl.BlockSpec((tm_eff, dim), lambda i: (i, 0)),          # x row-tile
                pl.BlockSpec((dim, hidden), lambda i: (0, 0)),          # W1 (resident)
                pl.BlockSpec((1, hidden), lambda i: (0, 0)),            # b1
                pl.BlockSpec((hidden, num_tokens), lambda i: (0, 0)),   # Wq (resident)
                pl.BlockSpec((1, num_tokens), lambda i: (0, 0)),        # bq
            ],
            out_specs=pl.BlockSpec((tm_eff, num_tokens), lambda i: (i, 0)),
        ),
        compiler_params=pltpu.CompilerParams(
            dimension_semantics=("parallel",),      # megacore / v7x 2-TC sharding
            vmem_limit_bytes=64 << 20,
        ),
        cost_estimate=cost,
    )(xm, w1, b1_2d, wq, bq)

    out = out[:M]
    return out.reshape(*orig_shape[:-1], num_tokens)


def dueling_head_ref(x, w1, b1, wa, ba, wv, bv):
    """Pure-JAX reference matching the PyTorch forward."""
    h = x @ w1 + b1
    h = h * jax.nn.sigmoid(h)
    adv = h @ wa + ba
    adv = adv - jnp.mean(adv, axis=-1, keepdims=True)
    val = h @ wv + bv
    return val + adv


if __name__ == "__main__":
    # module config
    dim = 32
    expansion_factor = 2
    dim_hidden = int(dim * expansion_factor)   # 64
    num_tokens = 256

    # input: (batch, seq, dim)  -- ragged M (16) exercises the padding path
    batch, seq = 2, 8

    key = jax.random.PRNGKey(0)
    kx, k1, k2, k3, k4, k5, k6 = jax.random.split(key, 7)

    x = jax.random.normal(kx, (batch, seq, dim), dtype=jnp.float32)

    # deterministic synthetic parameters (weights stored as (in, out))
    w1 = jax.random.normal(k1, (dim, dim_hidden), jnp.float32) * 0.05
    b1 = jax.random.normal(k2, (dim_hidden,), jnp.float32) * 0.05
    wa = jax.random.normal(k3, (dim_hidden, num_tokens), jnp.float32) * 0.05
    ba = jax.random.normal(k4, (num_tokens,), jnp.float32) * 0.05
    wv = jax.random.normal(k5, (dim_hidden, 1), jnp.float32) * 0.05
    bv = jax.random.normal(k6, (1,), jnp.float32) * 0.05

    q = dueling_head(x, w1, b1, wa, ba, wv, bv)
    q = jax.block_until_ready(q)

    q_ref = dueling_head_ref(x, w1, b1, wa, ba, wv, bv)
    assert q.shape == (batch, seq, num_tokens), q.shape
    assert jnp.allclose(q, q_ref, atol=1e-4, rtol=1e-4), float(
        jnp.max(jnp.abs(q - q_ref)))

    print("KERNEL_OK")
</pallas_src>

<mosaic_0001>
module attributes {stable_mosaic.version = 11 : i64} {
  func.func @_dueling_kernel(%arg0: i32, %arg1: memref<16x32xf32, #tpu.memory_space<vmem>>, %arg2: memref<32x64xf32, #tpu.memory_space<vmem>>, %arg3: memref<1x64xf32, #tpu.memory_space<vmem>>, %arg4: memref<64x256xf32, #tpu.memory_space<vmem>>, %arg5: memref<1x256xf32, #tpu.memory_space<vmem>>, %arg6: memref<16x256xf32, #tpu.memory_space<vmem>>) attributes {dimension_semantics = [#tpu.dimension_semantics<parallel>], iteration_bounds = array<i64: 1>, scalar_prefetch = 0 : i64, scratch_operands = 0 : i64, tpu.core_type = #tpu.core_type<tc>, window_params = [{transform_indices = @transform_0, window_bounds = array<i64: 16, 32>}, {pipeline_mode = #tpu.pipeline_mode<synchronous>, transform_indices = @transform_1, window_bounds = array<i64: 32, 64>}, {pipeline_mode = #tpu.pipeline_mode<synchronous>, transform_indices = @transform_2, window_bounds = array<i64: 1, 64>}, {pipeline_mode = #tpu.pipeline_mode<synchronous>, transform_indices = @transform_3, window_bounds = array<i64: 64, 256>}, {pipeline_mode = #tpu.pipeline_mode<synchronous>, transform_indices = @transform_4, window_bounds = array<i64: 1, 256>}, {transform_indices = @transform_5, window_bounds = array<i64: 16, 256>}]} {
    %c0 = arith.constant 0 : index
    %c0_0 = arith.constant 0 : index
    %0 = vector.load %arg1[%c0, %c0_0] : memref<16x32xf32, #tpu.memory_space<vmem>>, vector<16x32xf32>
    %c0_1 = arith.constant 0 : index
    %c0_2 = arith.constant 0 : index
    %1 = vector.load %arg2[%c0_1, %c0_2] : memref<32x64xf32, #tpu.memory_space<vmem>>, vector<32x64xf32>
    %cst = arith.constant dense<0.000000e+00> : vector<16x64xf32>
    %2 = tpu.matmul %0, %1, %cst {dimension_numbers = #tpu.dot_dimension_numbers<[1], [0], [0], [1], [0, 0, 1, 1], [], []>} : vector<16x32xf32>, vector<32x64xf32>, vector<16x64xf32> -> vector<16x64xf32>
    %c0_3 = arith.constant 0 : index
    %c0_4 = arith.constant 0 : index
    %3 = vector.load %arg3[%c0_3, %c0_4] : memref<1x64xf32, #tpu.memory_space<vmem>>, vector<1x64xf32>
    %4 = vector.broadcast %3 : vector<1x64xf32> to vector<16x64xf32>
    %5 = arith.addf %2, %4 : vector<16x64xf32>
    %6 = arith.negf %5 : vector<16x64xf32>
    %7 = math.exp %6 : vector<16x64xf32>
    %cst_5 = arith.constant 1.000000e+00 : f32
    %8 = vector.broadcast %cst_5 : f32 to vector<16x64xf32>
    %9 = arith.addf %8, %7 : vector<16x64xf32>
    %10 = arith.divf %8, %9 : vector<16x64xf32>
    %11 = arith.mulf %5, %10 : vector<16x64xf32>
    %c0_6 = arith.constant 0 : index
    %c0_7 = arith.constant 0 : index
    %12 = vector.load %arg4[%c0_6, %c0_7] : memref<64x256xf32, #tpu.memory_space<vmem>>, vector<64x256xf32>
    %cst_8 = arith.constant dense<0.000000e+00> : vector<16x256xf32>
    %13 = tpu.matmul %11, %12, %cst_8 {dimension_numbers = #tpu.dot_dimension_numbers<[1], [0], [0], [1], [0, 0, 1, 1], [], []>} : vector<16x64xf32>, vector<64x256xf32>, vector<16x256xf32> -> vector<16x256xf32>
    %c0_9 = arith.constant 0 : index
    %c0_10 = arith.constant 0 : index
    %14 = vector.load %arg5[%c0_9, %c0_10] : memref<1x256xf32, #tpu.memory_space<vmem>>, vector<1x256xf32>
    %15 = vector.broadcast %14 : vector<1x256xf32> to vector<16x256xf32>
    %16 = arith.addf %13, %15 : vector<16x256xf32>
    %c0_11 = arith.constant 0 : index
    %c0_12 = arith.constant 0 : index
    %17 = vector.load %arg6[%c0_11, %c0_12] : memref<16x256xf32, #tpu.memory_space<vmem>>, vector<16x256xf32>
    tpu.vector_store %arg6[%c0_11, %c0_12], %16 {strides = array<i32>} : memref<16x256xf32, #tpu.memory_space<vmem>>, vector<16x256xf32>,
    return
  }
  func.func @transform_0(%arg0: i32) -> (i32, i32) {
    %c0_i32 = arith.constant 0 : i32
    %c0_i32_0 = arith.constant 0 : i32
    return %arg0, %c0_i32 : i32, i32
  }
  func.func @transform_1(%arg0: i32) -> (i32, i32) {
    %c0_i32 = arith.constant 0 : i32
    %c0_i32_0 = arith.constant 0 : i32
    %c0_i32_1 = arith.constant 0 : i32
    return %c0_i32, %c0_i32_0 : i32, i32
  }
  func.func @transform_2(%arg0: i32) -> (i32, i32) {
    %c0_i32 = arith.constant 0 : i32
    %c0_i32_0 = arith.constant 0 : i32
    %c0_i32_1 = arith.constant 0 : i32
    return %c0_i32, %c0_i32_0 : i32, i32
  }
  func.func @transform_3(%arg0: i32) -> (i32, i32) {
    %c0_i32 = arith.constant 0 : i32
    %c0_i32_0 = arith.constant 0 : i32
    %c0_i32_1 = arith.constant 0 : i32
    return %c0_i32, %c0_i32_0 : i32, i32
  }
  func.func @transform_4(%arg0: i32) -> (i32, i32) {
    %c0_i32 = arith.constant 0 : i32
    %c0_i32_0 = arith.constant 0 : i32
    %c0_i32_1 = arith.constant 0 : i32
    return %c0_i32, %c0_i32_0 : i32, i32
  }
  func.func @transform_5(%arg0: i32) -> (i32, i32) {
    %c0_i32 = arith.constant 0 : i32
    %c0_i32_0 = arith.constant 0 : i32
    return %arg0, %c0_i32 : i32, i32
  }
}

</mosaic_0001>

<bundles_post_ra>
// kernel: dueling_head.1
= control target key start
LH: loop header
LB: loop body
LE: loop exit
PB: predicated region body
PF: predicated region fallthrough
CT: control target
= control target key end

     0   :  { %vm34_vm0 = vcmask 261120   ;;  %s429_s0 = inlined_call_operand.vmem [shape: f32[16,32], index: 0, kind: input, shape index: {}]   ;;  %s430_s1 = inlined_call_operand.vmem [shape: f32[32,64], index: 1, kind: input, shape index: {}]   ;;  %s431_s2 = inlined_call_operand.vmem [shape: f32[1,64], index: 2, kind: input, shape index: {}]   ;;  %s432_s3 = inlined_call_operand.vmem [shape: f32[64,256], index: 3, kind: input, shape index: {}]   ;;  %s433_s4 = inlined_call_operand.vmem [shape: f32[1,256], index: 4, kind: input, shape index: {}]   ;;  %s434_s5 = inlined_call_operand.hbm [shape: f32[16,256], index: 5, kind: output, shape index: {}]  }
   0x1   :  { %v26_v0 = vld [vmem:[%s430_s1 + $0x18] sm:$0xff]  ;;  %v25_v1 = vld [vmem:[%s430_s1 + $0x10] sm:$0xff]  ;;  %v21_v2 = vld [vmem:[%s429_s0] sm:$0xff] }
   0x2   :  { %275 = vmatprep.subr.mxu0 %v26_v0  ;;  %v24_v3 = vld [vmem:[%s430_s1 + $0x8] sm:$0xff]  ;;  %283 = vmatprep.mubr.msk.f32.mxu0 %vm34_vm0, %v21_v2 }
   0x3   :  { %276 = vmatpush3.msra.mxu0 %v26_v0 }
   0x4   :  { %10 = vsyncpa [#allocation3], 0  ;;  %277 = vmatprep.subr.mxu0 %v25_v1  ;;  %v23_v4 = vld [vmem:[%s430_s1] sm:$0xff]  ;;  %v22_v5 = vld [vmem:[%s429_s0 + $0x8] sm:$0xff]  ;;  %v320_v22 = vmov 0.0   ;;  %vm158_vm1 = vcmask 523264   ;;  %v148_v38 = vlaneseq }
   0x5   :  { %278 = vmatpush3.msra.mxu0 %v25_v1  ;;  %v145_v6 = vld [vmem:[%s432_s3 + $0x78] sm:$0xff]  ;;  %v144_v7 = vld [vmem:[%s432_s3 + $0x70] sm:$0xff]  ;;  %v143_v8 = vld [vmem:[%s432_s3 + $0x68] sm:$0xff]  ;;  %229 = vmatprep.mubr.f32.mxu1 %v320_v22  ;;  %s321_s0 = smov [#allocation2]  }
   0x6   :  { %279 = vmatprep.subr.mxu0 %v24_v3  ;;  %181 = vmatprep.subr.mxu1 %v145_v6  ;;  %v142_v9 = vld [vmem:[%s432_s3 + $0x60] sm:$0xff]  ;;  %v141_v10 = vld [vmem:[%s432_s3 + $0x58] sm:$0xff]  ;;  %v140_v11 = vld [vmem:[%s432_s3 + $0x50] sm:$0xff]  ;;  %v149_v39 = vshrl.u32 %v148_v38, 7  ;;  %s251_s11 = sshll.u32 %s321_s0, 4  ;;  %s252_s11 = int_to_ptr.vmem [resolvable:$true] %s251_s11 }
   0x7   :  { %280 = vmatpush3.msra.mxu0 %v24_v3  ;;  %182 = vmatpush1.msra.mxu1 %v144_v7  ;;  %v139_v12 = vld [vmem:[%s432_s3 + $0x48] sm:$0xff]  ;;  %v138_v13 = vld [vmem:[%s432_s3 + $0x40] sm:$0xff]  ;;  %v137_v14 = vld [vmem:[%s432_s3 + $0x38] sm:$0xff]  ;;  %s298_s12 = scalar_lea.vmem %s252_s11, 512  ;;  %p303_p1 = scmp.lt.s32.totalorder %s252_s11, %s252_s11 }
   0x8   :  { %281 = vmatprep.subr.mxu0 %v23_v4  ;;  %183 = vmatprep.subr.mxu1 %v143_v8  ;;  %v136_v15 = vld [vmem:[%s432_s3 + $0x30] sm:$0xff]  ;;  %v135_v16 = vld [vmem:[%s432_s3 + $0x28] sm:$0xff]  ;;  %v134_v17 = vld [vmem:[%s432_s3 + $0x20] sm:$0xff]  ;;  %v150_v40 = vsub.s32 0, %v149_v39  ;;  %v154_v42 = vsub.s32 1, %v149_v39  ;;  %p299_p0 = scmp.ne.s32.totalorder %s252_s11, %s298_s12  ;;  %p304_p2 = scmp.lt.s32.totalorder %s298_s12, %s298_s12 }
   0x9   :  { %282 = vmatpush3.msra.mxu0 %v23_v4  ;;  %184 = vmatpush1.msra.mxu1 %v142_v9  ;;  %v133_v18 = vld [vmem:[%s432_s3 + $0x18] sm:$0xff]  ;;  %v132_v19 = vld [vmem:[%s432_s3 + $0x10] sm:$0xff]  ;;  %v131_v20 = vld [vmem:[%s432_s3 + $0x8] sm:$0xff] }
   0xa   :  { %284 = vmatmul.mubr.msk.f32.vlgmr.msra.gmra.mxu0 %vm34_vm0, %v22_v5  ;;  %185 = vmatprep.subr.mxu1 %v141_v10  ;;  %v130_v21 = vld [vmem:[%s432_s3] sm:$0xff]  ;;  %p305_p3 = por %p304_p2, %p303_p1 }
   0xb   :  { %186 = vmatpush1.msra.mxu1 %v140_v11  ;;  %v262_v23 = vld [vmem:[%s431_s2] ss:$0 sm:$0xff] }
   0xc   :  { %187 = vmatprep.subr.mxu1 %v139_v12  ;;  %v146_v41 = vld [vmem:[%s433_s4] sm:$0x3]  ;;  %p306_p4 = pnand %p305_p3, %p299_p0 }
   0xd   :  { %188 = vmatpush1.msra.mxu1 %v138_v13  ;;  %v151_v43 = vrot.slane %v146_v41, %v150_v40  ;;  %v155_v44 = vrot.slane %v146_v41, %v154_v42 }
   0xe   :  { %189 = vmatprep.subr.mxu1 %v137_v14 }
   0xf   :  { %190 = vmatpush1.msra.mxu1 %v136_v15 }
  0x10   :  { %191 = vmatprep.subr.mxu1 %v135_v16 }
  0x11   :  { %192 = vmatpush1.msra.mxu1 %v134_v17 }
  0x12   :  { %193 = vmatprep.subr.mxu1 %v133_v18 }
  0x13   :  { %194 = vmatpush1.msra.mxu1 %v132_v19 }
  0x14   :  { %195 = vmatprep.subr.mxu1 %v131_v20 }
  0x15   :  { %196 = vmatpush1.msra.mxu1 %v130_v21 }
  0xca   :  { %v285_v24 = vpop.f32.mrf.mxu0 }
  0xcb   :  { %v113_v25 = vadd.f32 %v285_v24, %v262_v23 }
  0xcc   :  { %v107_v26 = vpop.f32.mrf.mxu0 }
  0xcd   :  { %v266_v27 = vmul.f32 -1.442695, %v113_v25  ;;  %v108_v28 = vadd.f32 %v262_v23, %v107_v26 }
  0xcf   :  { %290 = vpow2.f32 %v266_v27  ;;  %v265_v29 = vmul.f32 -1.442695, %v108_v28 }
  0xd1   :  { %292 = vpow2.f32 %v265_v29 }
  0xdc   :  { %v291_v30 = vpop.eup %290 }
  0xdd   :  { %v123_v32 = vadd.f32 1.0, %v291_v30 }
  0xde   :  { %v293_v31 = vpop.eup %292 }
  0xdf   :  { %v122_v33 = vadd.f32 1.0, %v293_v31 }
  0xe1   :  { %294 = vrcp.f32 %v122_v33 }
  0xe2   :  { %296 = vrcp.f32 %v123_v32 }
  0xee   :  { %v295_v34 = vpop.eup %294 }
  0xef   :  { %v128_v35 = vmul.f32 %v295_v34, %v108_v28  ;;  %v297_v36 = vpop.eup %296 }
  0xf0   :  { %v129_v37 = vmul.f32 %v297_v36, %v113_v25 }
  0xf1   :  { %267 = vmatmul.mubr.msk.f32.vlgmr.msra.gmra.mxu1 %vm158_vm1, %v128_v35 }
  0xf2   :  { %235 = vmatprep.mubr.f32.mxu1 %v320_v22 }
  0xf5   :  { %268 = vmatmul.mubr.msk.f32.gmra.mxu1 %vm158_vm1, %v129_v37 }
 0x1b1   :  { %v231_v45 = vpop.f32.mrf.mxu1 }
 0x1b2   :  { %v232_v46 = vadd.f32 %v231_v45, %v151_v43 }
 0x1b3   :  { %v233_v47 = vpop.f32.mrf.mxu1 }
 0x1b4   :  { %242 = vst [vmem:[#allocation2] sm:$0xff] %v232_v46  ;;  %v234_v48 = vadd.f32 %v233_v47, %v155_v44 }
 0x1b5   :  { %v237_v49 = vpop.f32.mrf.mxu1 }
 0x1b6   :  { %243 = vst [vmem:[#allocation2 + $0x8] sm:$0xff] %v234_v48  ;;  %v238_v50 = vadd.f32 %v237_v49, %v151_v43 }
 0x1b7   :  { %v239_v51 = vpop.f32.mrf.mxu1 }
 0x1b8   :  { %244 = vst [vmem:[#allocation2 + $0x10] sm:$0xff] %v238_v50  ;;  %v240_v52 = vadd.f32 %v239_v51, %v155_v44 }
 0x1ba   :  { %245 = vst [vmem:[#allocation2 + $0x18] sm:$0xff] %v240_v52 }
 0x1bb   :  { %309 = shalt.err (!%p306_p4)
}
 0x1bc   :  { %s322_s4 = smov 256   ;;  %s323_s13 = smov 16  }
 0x1bd   :  { %257 = dma.vmem_to_hbm [thread:$0]  %s252_s11, 512, %s434_s5, [#allocation3], %s322_s4, %s322_s4, %s323_s13  }
 0x1be   :  { %318 = dma.done.wait [#allocation3], 512  }
 0x1bf   :  { %319 = vsyncadd [#allocation3], 4294966784 }
 0x1c0   :  { %261 = vsyncpa [#allocation3], 1 }

</bundles_post_ra>
